<compile_context>
chip_gen: v5e
topology: v5e:2x2
jax: 0.10.0
libtpu: 0.0.40
codegen_flags: <defaults>
</compile_context>

<pallas_src>
import functools

import jax
import jax.numpy as jnp
from jax.experimental import pallas as pl
from jax.experimental.pallas import tpu as pltpu

SLICE_START_ROW = 64      # x[..., 64:, :]
GUIDE_SCALE = -100.0


def _window_guide_kernel(x_ref, o_ref, *, col1, col2, width, row_start):
    # x_ref : (TB, rows, D) ; o_ref : (TB, T_tail)
    x = x_ref[...]
    xa = x[:, row_start:, col1:col1 + width]        # (TB, T_tail, W) static lane slice
    xb = x[:, row_start:, col2:col2 + width]
    d = (xa - xb).astype(jnp.float32)               # no-op cast for f32 inputs
    o_ref[...] = (GUIDE_SCALE * jnp.sum(d * d, axis=-1)).astype(o_ref.dtype)


def _choose_tb(bc, rows, d, budget_bytes=8 << 20):
    # How many (B*C) slabs per grid step: as many as fit a conservative VMEM
    # budget (double-buffered input block), preferring a single grid step.
    per_slab = 2 * rows * d * 4
    if bc * per_slab <= budget_bytes:
        return bc
    cap = max(1, budget_bytes // per_slab)
    for tb in range(min(cap, bc), 0, -1):
        if bc % tb == 0 and (tb % 8 == 0 or tb == bc):
            return tb
    return bc


def windowed_sq_dist_guide(x, col1, col2, width):
    """General path: -100 * sum_k (x[..,64:,col1+k] - x[..,64:,col2+k])^2, k < width."""
    B, C, T, D = x.shape
    t_tail = T - SLICE_START_ROW
    assert width > 0 and col1 >= 0 and col2 >= 0
    assert col1 + width <= D and col2 + width <= D
    bc = B * C
    xr = x.reshape(bc, T, D)          # free reshape: merges leading dims only

    # Express the 64-row offset in the BlockSpec when it tiles cleanly, so the
    # first 64 rows are never read from HBM; otherwise DMA full rows and slice
    # statically in-kernel.
    if SLICE_START_ROW % t_tail == 0 and T % t_tail == 0:
        rows, row_start = t_tail, 0
        time_block = SLICE_START_ROW // t_tail
    else:
        rows, row_start = T, SLICE_START_ROW
        time_block = 0

    tb = _choose_tb(bc, rows, D)
    grid = (bc // tb,)
    kernel = functools.partial(_window_guide_kernel, col1=col1, col2=col2,
                               width=width, row_start=row_start)

    out = pl.pallas_call(
        kernel,
        out_shape=jax.ShapeDtypeStruct((bc, t_tail), jnp.float32),
        grid_spec=pltpu.PrefetchScalarGridSpec(
            num_scalar_prefetch=0,
            grid=grid,
            in_specs=[pl.BlockSpec((tb, rows, D),
                                   lambda i: (i, time_block, 0))],
            out_specs=pl.BlockSpec((tb, t_tail), lambda i: (i, 0)),
        ),
        compiler_params=pltpu.CompilerParams(
            dimension_semantics=("parallel",)),
    )(xr)
    return out.reshape(B, C, t_tail)


def pos_guide(x, t, cube, cube_other):
    """Faithful PosGuide.forward: x (B, C, T, D); returns (B, C, T-64)."""
    del t   # unused by the torch forward
    B, C, T, D = x.shape
    t_tail = T - SLICE_START_ROW
    col1 = 7 + cube * 8
    col2 = 7 + cube_other * 8
    width = col1 - col1     # torch slice [c:c] -> start == stop -> empty window
    if width == 0:
        # Provably all-zero output: skip all HBM traffic and the kernel launch.
        return jnp.zeros((B, C, t_tail), dtype=jnp.float32)
    return windowed_sq_dist_guide(x, col1, col2, width)


if __name__ == "__main__":
    key = jax.random.PRNGKey(0)
    # Module shapes: H = 128 timesteps, obs_dim = 7 + num_cubes * 8 = 39 (4 cubes).
    B, C, T, D = 2, 1, 128, 39
    cube, cube_other = 0, 1

    x = jax.random.normal(key, (B, C, T, D), dtype=jnp.float32)
    t = jnp.zeros((B,), dtype=jnp.int32)   # unused, matches forward(x, t) signature

    # 1) Module-faithful path: width-0 window -> provably zeros (short-circuited).
    pred = jax.block_until_ready(pos_guide(x, t, cube, cube_other))
    c1, c2 = 7 + cube * 8, 7 + cube_other * 8
    ref = -100.0 * jnp.sum(
        (x[..., SLICE_START_ROW:, c1:c1] - x[..., SLICE_START_ROW:, c2:c2]) ** 2,
        axis=-1)
    assert pred.shape == ref.shape == (B, C, T - SLICE_START_ROW), (pred.shape, ref.shape)
    assert jnp.allclose(pred, ref, atol=1e-6), "module-path mismatch"

    # 2) Exercise the Pallas kernel on the general (width > 0) hot path with the
    #    8-wide per-cube window the module presumably intended.
    W = 8
    got = jax.block_until_ready(windowed_sq_dist_guide(x, c1, c2, W))
    ref_w = -100.0 * jnp.sum(
        (x[..., SLICE_START_ROW:, c1:c1 + W] - x[..., SLICE_START_ROW:, c2:c2 + W]) ** 2,
        axis=-1)
    assert got.shape == ref_w.shape == (B, C, T - SLICE_START_ROW)
    assert jnp.allclose(got, ref_w, rtol=1e-5, atol=1e-4), "general-path mismatch"

    print("KERNEL_OK")
</pallas_src>

<mosaic_0001>
module attributes {stable_mosaic.version = 11 : i64} {
  func.func @_window_guide_kernel(%arg0: i32, %arg1: memref<2x64x39xf32, #tpu.memory_space<vmem>>, %arg2: memref<2x64xf32, #tpu.memory_space<vmem>>) attributes {dimension_semantics = [#tpu.dimension_semantics<parallel>], iteration_bounds = array<i64: 1>, scalar_prefetch = 0 : i64, scratch_operands = 0 : i64, tpu.core_type = #tpu.core_type<tc>, window_params = [{transform_indices = @transform_0, window_bounds = array<i64: 2, 64, 39>}, {transform_indices = @transform_1, window_bounds = array<i64: 2, 64>}]} {
    %c0 = arith.constant 0 : index
    %c0_0 = arith.constant 0 : index
    %c0_1 = arith.constant 0 : index
    %0 = vector.load %arg1[%c0, %c0_0, %c0_1] : memref<2x64x39xf32, #tpu.memory_space<vmem>>, vector<2x64x39xf32>
    %1 = vector.extract_strided_slice %0 {offsets = [0, 0, 7], sizes = [2, 64, 8], strides = [1, 1, 1]} : vector<2x64x39xf32> to vector<2x64x8xf32>
    %2 = vector.extract_strided_slice %0 {offsets = [0, 0, 15], sizes = [2, 64, 8], strides = [1, 1, 1]} : vector<2x64x39xf32> to vector<2x64x8xf32>
    %3 = arith.subf %1, %2 : vector<2x64x8xf32>
    %4 = arith.mulf %3, %3 : vector<2x64x8xf32>
    %cst = arith.constant dense<0.000000e+00> : vector<2x64xf32>
    %5 = vector.multi_reduction <add>, %4, %cst [2] : vector<2x64x8xf32> to vector<2x64xf32>
    %cst_2 = arith.constant -1.000000e+02 : f32
    %6 = vector.broadcast %cst_2 : f32 to vector<2x64xf32>
    %7 = arith.mulf %6, %5 : vector<2x64xf32>
    %c0_3 = arith.constant 0 : index
    %c0_4 = arith.constant 0 : index
    %8 = vector.load %arg2[%c0_3, %c0_4] : memref<2x64xf32, #tpu.memory_space<vmem>>, vector<2x64xf32>
    tpu.vector_store %arg2[%c0_3, %c0_4], %7 {strides = array<i32>} : memref<2x64xf32, #tpu.memory_space<vmem>>, vector<2x64xf32>,
    return
  }
  func.func @transform_0(%arg0: i32) -> (i32, i32, i32) {
    %c1_i32 = arith.constant 1 : i32
    %c0_i32 = arith.constant 0 : i32
    %c0_i32_0 = arith.constant 0 : i32
    return %arg0, %c1_i32, %c0_i32 : i32, i32, i32
  }
  func.func @transform_1(%arg0: i32) -> (i32, i32) {
    %c0_i32 = arith.constant 0 : i32
    %c0_i32_0 = arith.constant 0 : i32
    return %arg0, %c0_i32 : i32, i32
  }
}

</mosaic_0001>

<bundles_post_ra>
// kernel: tpu_custom_call.1
= control target key start
LH: loop header
LB: loop body
LE: loop exit
PB: predicated region body
PF: predicated region fallthrough
CT: control target
= control target key end

     0   :  { %s478_s10 = smov 120   ;;  %s610_s0 = inlined_call_operand.vmem [shape: f32[2,128,39], index: 0, kind: input, shape index: {}]   ;;  %s611_s1 = inlined_call_operand.hbm [shape: f32[2,64], index: 1, kind: output, shape index: {}]  }
   0x1   :  { %v435_v0 = vld [vmem:[%s610_s0 + $0x50] sm:$0xff]  ;;  %v433_v1 = vld [vmem:[%s610_s0 + $0x40] sm:$0xff] }
   0x2   :  { %141 = vrot.lane.b32.xlu1 %v435_v0, %s478_s10  ;;  %137 = vrot.lane.b32.xlu0 %v433_v1, %s478_s10  ;;  %v437_v2 = vld [vmem:[%s610_s0 + $0x60] sm:$0xff] }
   0x3   :  { %145 = vrot.lane.b32.xlu2 %v437_v2, %s478_s10 }
   0x4   :  { %6 = vsyncpa [#allocation4], 0  ;;  %v436_v3 = vld [vmem:[%s610_s0 + $0x58] sm:$0xff]  ;;  %v434_v4 = vld [vmem:[%s610_s0 + $0x48] sm:$0xff]  ;;  %s479_s11 = smov 121   ;;  %vm281_vm0 = vcmask 64512  }
   0x5   :  { %v512_v5 = vld [vmem:[%s610_s0 + $0x68] sm:$0xff]  ;;  %v441_v6 = vld [vmem:[%s610_s0 + $0xc0] sm:$0xff]  ;;  %v439_v7 = vld [vmem:[%s610_s0 + $0x70] sm:$0xff]  ;;  %vm367_vm1 = vcmask 130112   ;;  %vm371_vm2 = vcmask 195712   ;;  %vm375_vm3 = vcmask 261312  }
   0x6   :  { %v442_v8 = vld [vmem:[%s610_s0 + $0xc8] sm:$0xff]  ;;  %v443_v9 = vld [vmem:[%s610_s0 + $0xd0] sm:$0xff]  ;;  %v444_v10 = vld [vmem:[%s610_s0 + $0xd8] sm:$0xff]  ;;  %vm379_vm4 = vcmask 326912   ;;  %vm383_vm5 = vcmask 392512   ;;  %vm387_vm6 = vcmask 458112  }
   0x7   :  { %v445_v11 = vld [vmem:[%s610_s0 + $0xe0] sm:$0xff]  ;;  %v446_v12 = vld [vmem:[%s610_s0 + $0xe8] sm:$0xff]  ;;  %v548_v13 = vld [vmem:[%s610_s0 + $0xf0] sm:$0xff]  ;;  %vm391_vm7 = vcmask 523712   ;;  %s420_s14 = sshll.u32 %s611_s1, 4  ;;  %vm408_vm8 = vcmask 1041409   ;;  %s421_s14 = int_to_ptr.hbm [resolvable:$true] %s420_s14 }
   0x8   :  { %v440_v14 = vld [vmem:[%s610_s0 + $0x78] sm:$0xff]  ;;  %vm411_vm9 = vcmask 517120  }
   0x9   :  { %v448_v15 = vld [vmem:[%s610_s0 + $0xf8] sm:$0xff]  ;;  %s480_s0 = smov [#allocation3]  }
   0xa   :  { %143 = vrot.lane.b32.xlu1 %v436_v3, %s478_s10  ;;  %139 = vrot.lane.b32.xlu0 %v434_v4, %s478_s10 }
   0xb   :  { %147 = vrot.lane.b32.xlu2 %v512_v5, %s478_s10 }
  0x12   :  { %153 = vrot.lane.b32.xlu1 %v441_v6, %s478_s10  ;;  %149 = vrot.lane.b32.xlu0 %v439_v7, %s478_s10 }
  0x13   :  { %155 = vrot.lane.b32.xlu2 %v442_v8, %s478_s10 }
  0x1a   :  { %157 = vrot.lane.b32.xlu0 %v443_v9, %s478_s10  ;;  %159 = vrot.lane.b32.xlu1 %v444_v10, %s478_s10 }
  0x1b   :  { %161 = vrot.lane.b32.xlu2 %v445_v11, %s478_s10 }
  0x22   :  { %163 = vrot.lane.b32.xlu0 %v446_v12, %s478_s10  ;;  %165 = vrot.lane.b32.xlu1 %v548_v13, %s478_s10 }
  0x23   :  { %151 = vrot.lane.b32.xlu2 %v440_v14, %s478_s10 }
  0x2a   :  { %167 = vrot.lane.b32.xlu0 %v448_v15, %s478_s10  ;;  %s418_s10 = sshll.u32 %s480_s0, 4  ;;  %s419_s10 = int_to_ptr.vmem [resolvable:$true] %s418_s10 }
  0x5d   :  { %v146_v16 = vpop.permute.xlu2 %145 }
  0x5e   :  { %v189_v32 = vsub.f32 %v437_v2, %v146_v16 }
  0x60   :  { %v205_v39 = vmul.f32 %v189_v32, %v189_v32 }
  0x65   :  { %v148_v17 = vpop.permute.xlu2 %147 }
  0x66   :  { %v190_v49 = vsub.f32 %v512_v5, %v148_v17 }
  0x68   :  { %v206_v56 = vmul.f32 %v190_v49, %v190_v49 }
  0x6d   :  { %v156_v24 = vpop.permute.xlu2 %155 }
  0x6e   :  { %v194_v31 = vsub.f32 %v442_v8, %v156_v24 }
  0x70   :  { %v210_v35 = vmul.f32 %v194_v31, %v194_v31 }
  0x74   :  { %v142_v18 = vpop.permute.xlu1 %141  ;;  %v138_v19 = vpop.permute.xlu0 %137 }
  0x75   :  { %v187_v20 = vsub.f32 %v435_v0, %v142_v18  ;;  %v185_v21 = vsub.f32 %v433_v1, %v138_v19  ;;  %v162_v37 = vpop.permute.xlu2 %161 }
  0x76   :  { %v197_v40 = vsub.f32 %v445_v11, %v162_v37 }
  0x77   :  { %v203_v22 = vmul.f32 %v187_v20, %v187_v20  ;;  %v201_v23 = vmul.f32 %v185_v21, %v185_v21 }
  0x78   :  { %v213_v43 = vmul.f32 %v197_v40, %v197_v40  ;;  %v362_v40 = vlaneseq }
  0x79   :  { %237 = vrot.lane.b32.xlu0 %v203_v22, %s479_s11  ;;  %233 = vrot.lane.b32.xlu1 %v201_v23, %s479_s11 }
  0x7c   :  { %v144_v25 = vpop.permute.xlu1 %143  ;;  %v140_v26 = vpop.permute.xlu0 %139 }
  0x7d   :  { %v188_v27 = vsub.f32 %v436_v3, %v144_v25  ;;  %v186_v28 = vsub.f32 %v434_v4, %v140_v26  ;;  %v152_v52 = vpop.permute.xlu2 %151 }
  0x7e   :  { %v192_v57 = vsub.f32 %v440_v14, %v152_v52 }
  0x7f   :  { %v204_v29 = vmul.f32 %v188_v27, %v188_v27  ;;  %v202_v30 = vmul.f32 %v186_v28, %v186_v28 }
  0x80   :  { %v208_v60 = vmul.f32 %v192_v57, %v192_v57 }
  0x81   :  { %239 = vrot.lane.b32.xlu1 %v204_v29, %s479_s11  ;;  %235 = vrot.lane.b32.xlu2 %v202_v30, %s479_s11 }
  0x84   :  { %v154_v33 = vpop.permute.xlu1 %153  ;;  %v150_v34 = vpop.permute.xlu0 %149 }
  0x85   :  { %v193_v36 = vsub.f32 %v441_v6, %v154_v33  ;;  %v191_v48 = vsub.f32 %v439_v7, %v150_v34 }
  0x87   :  { %v209_v38 = vmul.f32 %v193_v36, %v193_v36  ;;  %v207_v53 = vmul.f32 %v191_v48, %v191_v48 }
  0x89   :  { %249 = vrot.lane.b32.xlu0 %v209_v38, %s479_s11  ;;  %251 = vrot.lane.b32.xlu1 %v210_v35, %s479_s11 }
  0x8a   :  { %241 = vrot.lane.b32.xlu2 %v205_v39, %s479_s11 }
  0x8c   :  { %v158_v41 = vpop.permute.xlu0 %157  ;;  %v160_v42 = vpop.permute.xlu1 %159 }
  0x8d   :  { %v195_v44 = vsub.f32 %v443_v9, %v158_v41  ;;  %v196_v45 = vsub.f32 %v444_v10, %v160_v42  ;;  %v363_v41 = vand.u32 127, %v362_v40 }
  0x8f   :  { %v211_v46 = vmul.f32 %v195_v44, %v195_v44  ;;  %v212_v47 = vmul.f32 %v196_v45, %v196_v45 }
  0x91   :  { %257 = vrot.lane.b32.xlu1 %v213_v43, %s479_s11  ;;  %255 = vrot.lane.b32.xlu0 %v212_v47, %s479_s11  ;;  %v365_v47 = vadd.s32 4294967288, %v363_v41 }
  0x92   :  { %253 = vrot.lane.b32.xlu2 %v211_v46, %s479_s11 }
  0x94   :  { %v164_v50 = vpop.permute.xlu0 %163  ;;  %v166_v55 = vpop.permute.xlu1 %165 }
  0x95   :  { %v198_v51 = vsub.f32 %v446_v12, %v164_v50  ;;  %v199_v58 = vsub.f32 %v548_v13, %v166_v55 }
  0x97   :  { %v214_v54 = vmul.f32 %v198_v51, %v198_v51  ;;  %v215_v62 = vmul.f32 %v199_v58, %v199_v58  ;;  %v369_v51 = vadd.s32 4294967280, %v363_v41 }
  0x99   :  { %245 = vrot.lane.b32.xlu1 %v207_v53, %s479_s11  ;;  %259 = vrot.lane.b32.xlu0 %v214_v54, %s479_s11  ;;  %v373_v53 = vadd.s32 4294967272, %v363_v41 }
  0x9a   :  { %243 = vrot.lane.b32.xlu2 %v206_v56, %s479_s11 }
  0x9c   :  { %v168_v59 = vpop.permute.xlu0 %167 }
  0x9d   :  { %v200_v61 = vsub.f32 %v448_v15, %v168_v59 }
  0x9f   :  { %v216_v63 = vmul.f32 %v200_v61, %v200_v61  ;;  %v377_v61 = vadd.s32 4294967264, %v363_v41 }
  0xa1   :  { %247 = vrot.lane.b32.xlu0 %v208_v60, %s479_s11  ;;  %263 = vrot.lane.b32.xlu1 %v216_v63, %s479_s11 }
  0xa2   :  { %261 = vrot.lane.b32.xlu2 %v215_v62, %s479_s11 }
  0xdb   :  { %v236_v0 = vpop.permute.xlu2 %235 }
  0xdc   :  { %v285_v1 = vsel %vm281_vm0, %v236_v0, 0.0 }
  0xdd   :  { %286 = vadd.xlane.f32.xlu0 %v285_v1 }
  0xe4   :  { %v242_v2 = vpop.permute.xlu2 %241 }
  0xe5   :  { %v294_v9 = vsel %vm281_vm0, %v242_v2, 0.0 }
  0xeb   :  { %v234_v3 = vpop.permute.xlu1 %233  ;;  %v238_v7 = vpop.permute.xlu0 %237 }
  0xec   :  { %v254_v4 = vpop.permute.xlu2 %253  ;;  %v282_v5 = vsel %vm281_vm0, %v234_v3, 0.0  ;;  %v288_v15 = vsel %vm281_vm0, %v238_v7, 0.0 }
  0xed   :  { %283 = vadd.xlane.f32.xlu2 %v282_v5  ;;  %v312_v6 = vsel %vm281_vm0, %v254_v4, 0.0 }
  0xee   :  { %313 = vadd.xlane.f32.xlu0 %v312_v6 }
  0xf3   :  { %v240_v8 = vpop.permute.xlu1 %239 }
  0xf4   :  { %v291_v16 = vsel %vm281_vm0, %v240_v8, 0.0  ;;  %v244_v22 = vpop.permute.xlu2 %243  ;;  %v381_v8 = vadd.s32 4294967256, %v363_v41 }
  0xf5   :  { %v297_v26 = vsel %vm281_vm0, %v244_v22, 0.0 }
  0xf6   :  { %295 = vadd.xlane.f32.xlu0 %v294_v9 }
  0xfb   :  { %v252_v10 = vpop.permute.xlu1 %251  ;;  %v250_v11 = vpop.permute.xlu0 %249 }
  0xfc   :  { %v309_v12 = vsel %vm281_vm0, %v252_v10, 0.0  ;;  %v306_v13 = vsel %vm281_vm0, %v250_v11, 0.0  ;;  %v262_v28 = vpop.permute.xlu2 %261  ;;  %v385_v10 = vadd.s32 4294967248, %v363_v41 }
  0xfd   :  { %310 = vadd.xlane.f32.xlu2 %v309_v12  ;;  %307 = vadd.xlane.f32.xlu1 %v306_v13  ;;  %v324_v30 = vsel %vm281_vm0, %v262_v28, 0.0 }
 0x103   :  { %v256_v14 = vpop.permute.xlu0 %255  ;;  %v258_v17 = vpop.permute.xlu1 %257 }
 0x104   :  { %v318_v18 = vsel %vm281_vm0, %v258_v17, 0.0  ;;  %v315_v19 = vsel %vm281_vm0, %v256_v14, 0.0 }
 0x105   :  { %289 = vadd.xlane.f32.xlu2 %v288_v15  ;;  %292 = vadd.xlane.f32.xlu1 %v291_v16 }
 0x10b   :  { %v260_v20 = vpop.permute.xlu0 %259  ;;  %v246_v23 = vpop.permute.xlu1 %245 }
 0x10c   :  { %v321_v21 = vsel %vm281_vm0, %v260_v20, 0.0  ;;  %v300_v25 = vsel %vm281_vm0, %v246_v23, 0.0  ;;  %v389_v20 = vadd.s32 4294967240, %v363_v41 }
 0x10d   :  { %319 = vadd.xlane.f32.xlu1 %v318_v18  ;;  %316 = vadd.xlane.f32.xlu2 %v315_v19 }
 0x10e   :  { %322 = vadd.xlane.f32.xlu0 %v321_v21 }
 0x113   :  { %v248_v24 = vpop.permute.xlu0 %247  ;;  %v264_v29 = vpop.permute.xlu1 %263 }
 0x114   :  { %v303_v27 = vsel %vm281_vm0, %v248_v24, 0.0  ;;  %v327_v31 = vsel %vm281_vm0, %v264_v29, 0.0 }
 0x115   :  { %301 = vadd.xlane.f32.xlu1 %v300_v25  ;;  %298 = vadd.xlane.f32.xlu2 %v297_v26 }
 0x116   :  { %304 = vadd.xlane.f32.xlu0 %v303_v27 }
 0x11d   :  { %325 = vadd.xlane.f32.xlu2 %v324_v30  ;;  %328 = vadd.xlane.f32.xlu1 %v327_v31 }
 0x150   :  { %v287_v32 = vpop.xlane.xlu0 %286 }
 0x151   :  { %v331_v48 = vmul.f32 -100.0, %v287_v32 }
 0x153   :  { %v366_v56 = vperm.slane %v331_v48, %v365_v47 }
 0x160   :  { %v284_v33 = vpop.xlane.xlu2 %283 }
 0x161   :  { %v314_v34 = vpop.xlane.xlu0 %313  ;;  %v330_v42 = vmul.f32 -100.0, %v284_v33 }
 0x162   :  { %v340_v60 = vmul.f32 -100.0, %v314_v34 }
 0x163   :  { %v364_v52 = vperm.slane %v330_v42, %v363_v41 }
 0x164   :  { %v396_v9 = vperm.slane %v340_v60, %v369_v51 }
 0x165   :  { %v368_v62 = vsel %vm367_vm1, %v366_v56, %v364_v52 }
 0x169   :  { %v296_v39 = vpop.xlane.xlu0 %295 }
 0x16a   :  { %v334_v2 = vmul.f32 -100.0, %v296_v39 }
 0x16c   :  { %v378_v16 = vperm.slane %v334_v2, %v377_v61 }
 0x170   :  { %v311_v35 = vpop.xlane.xlu2 %310  ;;  %v308_v36 = vpop.xlane.xlu1 %307 }
 0x171   :  { %v339_v49 = vmul.f32 -100.0, %v311_v35  ;;  %v338_v50 = vmul.f32 -100.0, %v308_v36 }
 0x173   :  { %v394_v57 = vperm.slane %v339_v49, %v365_v47  ;;  %v393_v58 = vperm.slane %v338_v50, %v363_v41 }
 0x175   :  { %v395_v6 = vsel %vm367_vm1, %v394_v57, %v393_v58 }
 0x176   :  { %v397_v18 = vsel %vm371_vm2, %v396_v9, %v395_v6 }
 0x178   :  { %v290_v37 = vpop.xlane.xlu2 %289  ;;  %v293_v38 = vpop.xlane.xlu1 %292 }
 0x179   :  { %v332_v45 = vmul.f32 -100.0, %v290_v37  ;;  %v333_v54 = vmul.f32 -100.0, %v293_v38 }
 0x17b   :  { %v370_v55 = vperm.slane %v332_v45, %v369_v51  ;;  %v374_v63 = vperm.slane %v333_v54, %v373_v53 }
 0x17d   :  { %v372_v3 = vsel %vm371_vm2, %v370_v55, %v368_v62 }
 0x17e   :  { %v376_v13 = vsel %vm375_vm3, %v374_v63, %v372_v3 }
 0x17f   :  { %v380_v23 = vsel %vm379_vm4, %v378_v16, %v376_v13 }
 0x180   :  { %v320_v43 = vpop.xlane.xlu1 %319  ;;  %v317_v44 = vpop.xlane.xlu2 %316 }
 0x181   :  { %v323_v46 = vpop.xlane.xlu0 %322  ;;  %v341_v59 = vmul.f32 -100.0, %v317_v44  ;;  %v342_v4 = vmul.f32 -100.0, %v320_v43 }
 0x182   :  { %v343_v14 = vmul.f32 -100.0, %v323_v46 }
 0x183   :  { %v398_v7 = vperm.slane %v341_v59, %v373_v53  ;;  %v400_v17 = vperm.slane %v342_v4, %v377_v61 }
 0x184   :  { %v402_v24 = vperm.slane %v343_v14, %v381_v8 }
 0x185   :  { %v399_v19 = vsel %vm375_vm3, %v398_v7, %v397_v18 }
 0x186   :  { %v401_v28 = vsel %vm379_vm4, %v400_v17, %v399_v19 }
 0x187   :  { %v403_v35 = vsel %vm383_vm5, %v402_v24, %v401_v28 }
 0x188   :  { %v302_v0 = vpop.xlane.xlu1 %301  ;;  %v299_v1 = vpop.xlane.xlu2 %298 }
 0x189   :  { %v335_v5 = vmul.f32 -100.0, %v299_v1  ;;  %v336_v11 = vmul.f32 -100.0, %v302_v0  ;;  %v305_v12 = vpop.xlane.xlu0 %304 }
 0x18a   :  { %v337_v21 = vmul.f32 -100.0, %v305_v12 }
 0x18b   :  { %v382_v15 = vperm.slane %v335_v5, %v381_v8  ;;  %v386_v22 = vperm.slane %v336_v11, %v385_v10 }
 0x18c   :  { %v390_v31 = vperm.slane %v337_v21, %v389_v20 }
 0x18d   :  { %v384_v25 = vsel %vm383_vm5, %v382_v15, %v380_v23 }
 0x18e   :  { %v388_v32 = vsel %vm387_vm6, %v386_v22, %v384_v25 }
 0x18f   :  { %v392_v37 = vsel %vm391_vm7, %v390_v31, %v388_v32 }
 0x190   :  { %v326_v26 = vpop.xlane.xlu2 %325  ;;  %v329_v27 = vpop.xlane.xlu1 %328 }
 0x191   :  { %v344_v29 = vmul.f32 -100.0, %v326_v26  ;;  %v345_v30 = vmul.f32 -100.0, %v329_v27 }
 0x193   :  { %v404_v33 = vperm.slane %v344_v29, %v385_v10  ;;  %v406_v34 = vperm.slane %v345_v30, %v389_v20 }
 0x195   :  { %v405_v36 = vsel %vm387_vm6, %v404_v33, %v403_v35 }
 0x196   :  { %v407_v38 = vsel %vm391_vm7, %v406_v34, %v405_v36 }
 0x197   :  { %v409_v39 = vsel %vm408_vm8, %v407_v38, %v392_v37 }
 0x198   :  { %412 = vst.msk [vmem:[#allocation3] sm:$0x3] %vm411_vm9, %v409_v39 }
 0x199   :  { %423 = dma.vmem_to_hbm [thread:$0]  %s419_s10, 32, %s421_s14, [#allocation4]  }
 0x19a   :  { %476 = dma.done.wait [#allocation4], 32  }
 0x19b   :  { %477 = vsyncadd [#allocation4], 4294967264 }
 0x19c   :  { %428 = vsyncpa [#allocation4], 1 }

</bundles_post_ra>
